<compile_context>
chip_gen: v7x
topology: tpu7x:2x2x1
jax: 0.10.0
libtpu: 0.0.40
codegen_flags: <defaults>
</compile_context>

<pallas_src>
import jax
import jax.numpy as jnp
from jax.experimental import pallas as pl
from jax.experimental.pallas import tpu as pltpu

NUM_CLASSES = 4
NUM_FEATURES = 256
HIDDEN = 128
OUT_PAD = 8        # padded logit width stored to HBM (wrapper slices [:, :4])
ROW_ALIGN = 16     # bf16 packs 2 rows/sublane -> (16,128) tile alignment


def _round_up(n, m):
    return (n + m - 1) // m * m


def _mlp_head_kernel(x_ref, w1_ref, b1_ref, w2_ref, b2_ref, w3_ref, b3_ref,
                     o_ref):
    # Cast x f32 -> compute dtype in-register (VPU op, hidden under the MXU);
    # all matmuls accumulate in f32.
    x = x_ref[...].astype(w1_ref.dtype)

    # Layer 1: (TB, 256) @ (256, 128) + bias, ReLU
    h1 = jnp.dot(x, w1_ref[...], preferred_element_type=jnp.float32)
    h1 = jnp.maximum(h1 + b1_ref[...], 0.0)

    # Layer 2: (TB, 128) @ (128, 128) + bias, ReLU
    h2 = jnp.dot(h1.astype(w2_ref.dtype), w2_ref[...],
                 preferred_element_type=jnp.float32)
    h2 = jnp.maximum(h2 + b2_ref[...], 0.0)

    # Layer 3: (TB, 128) @ (128, 8) + bias  (8 = 4 classes + 4 zero columns)
    logits = jnp.dot(h2.astype(w3_ref.dtype), w3_ref[...],
                     preferred_element_type=jnp.float32)
    o_ref[...] = (logits + b3_ref[...]).astype(o_ref.dtype)


def prepare_params(params, compute_dtype=jnp.bfloat16):
    """One-time parameter prep: cast weights to the MXU input dtype, keep
    biases f32, and zero-pad layer 3 from 4 to OUT_PAD output columns.
    Call once when weights are loaded; do NOT call per forward pass."""
    w3 = params["w3"].astype(compute_dtype)
    b3 = params["b3"].astype(jnp.float32)
    w3p = jnp.zeros((HIDDEN, OUT_PAD), compute_dtype).at[:, :NUM_CLASSES].set(w3)
    b3p = jnp.zeros((1, OUT_PAD), jnp.float32).at[:, :NUM_CLASSES].set(b3)
    return {
        "w1": params["w1"].astype(compute_dtype),
        "b1": params["b1"].astype(jnp.float32),
        "w2": params["w2"].astype(compute_dtype),
        "b2": params["b2"].astype(jnp.float32),
        "w3": w3p,
        "b3": b3p,
    }


def basic_classification_head(x, prepared, *, batch_tile=2048):
    """x: (B, NUM_FEATURES) float32; prepared: output of prepare_params."""
    B, F = x.shape
    assert F == NUM_FEATURES
    w1, b1 = prepared["w1"], prepared["b1"]
    w2, b2 = prepared["w2"], prepared["b2"]
    w3, b3 = prepared["w3"], prepared["b3"]

    # Batch tiling: 16-row aligned; prefer >=2 grid steps when the batch is
    # large enough so both v7x TensorCores get work and DMA overlaps compute
    # (harmless extra ~0.35 us step on single-TC v5e/v6e).
    tb = min(batch_tile, _round_up(B, ROW_ALIGN))
    if B <= tb and B > ROW_ALIGN:
        tb = _round_up(pl.cdiv(B, 2), ROW_ALIGN)
    grid = (pl.cdiv(B, tb),)   # ragged last block handled by Pallas masking

    def const(shape):
        # Weights/biases: same block every grid step -> DMA'd once, resident.
        return pl.BlockSpec(shape, lambda i: tuple(0 for _ in shape))

    w_item = jnp.dtype(w1.dtype).itemsize
    flops = 2 * B * (NUM_FEATURES * HIDDEN + HIDDEN * HIDDEN + HIDDEN * OUT_PAD)
    bytes_accessed = (
        x.size * x.dtype.itemsize                               # x read once (f32)
        + (w1.size + w2.size + w3.size) * w_item                # weights
        + (b1.size + b2.size + b3.size) * 4                     # biases (f32)
        + B * OUT_PAD * 4)                                      # narrow f32 out

    out = pl.pallas_call(
        _mlp_head_kernel,
        out_shape=jax.ShapeDtypeStruct((B, OUT_PAD), jnp.float32),
        grid=grid,
        in_specs=[
            pl.BlockSpec((tb, NUM_FEATURES), lambda i: (i, 0)),
            const(w1.shape), const(b1.shape),
            const(w2.shape), const(b2.shape),
            const(w3.shape), const(b3.shape),
        ],
        out_specs=pl.BlockSpec((tb, OUT_PAD), lambda i: (i, 0)),
        compiler_params=pltpu.CompilerParams(
            dimension_semantics=("parallel",)),
        cost_estimate=pl.CostEstimate(flops=flops, transcendentals=0,
                                      bytes_accessed=bytes_accessed),
    )(x, w1, b1, w2, b2, w3, b3)

    return out[:, :NUM_CLASSES].astype(x.dtype)


def init_params(key):
    """Deterministic synthetic init matching nn.Linear shapes (stored transposed)."""
    k1, k2, k3, k4, k5, k6 = jax.random.split(key, 6)

    def linear(kw, kb, fan_in, fan_out):
        bound = 1.0 / jnp.sqrt(fan_in)
        w = jax.random.uniform(kw, (fan_in, fan_out), jnp.float32, -bound, bound)
        b = jax.random.uniform(kb, (1, fan_out), jnp.float32, -bound, bound)
        return w, b

    w1, b1 = linear(k1, k2, NUM_FEATURES, HIDDEN)
    w2, b2 = linear(k3, k4, HIDDEN, HIDDEN)
    w3, b3 = linear(k5, k6, HIDDEN, NUM_CLASSES)
    return {"w1": w1, "b1": b1, "w2": w2, "b2": b2, "w3": w3, "b3": b3}


def _reference(x, p, compute_dtype=jnp.float32):
    """Pure-JAX reference. compute_dtype=jnp.bfloat16 mirrors the kernel's
    bf16-input / f32-accumulate math; float32 matches the PyTorch module."""
    cd = compute_dtype
    h1 = jnp.dot(x.astype(cd), p["w1"].astype(cd),
                 preferred_element_type=jnp.float32) + p["b1"]
    h1 = jnp.maximum(h1, 0.0)
    h2 = jnp.dot(h1.astype(cd), p["w2"].astype(cd),
                 preferred_element_type=jnp.float32) + p["b2"]
    h2 = jnp.maximum(h2, 0.0)
    out = jnp.dot(h2.astype(cd), p["w3"].astype(cd),
                  preferred_element_type=jnp.float32) + p["b3"]
    return out.astype(x.dtype)


if __name__ == "__main__":
    key = jax.random.PRNGKey(0)
    kx, kx2, kp = jax.random.split(key, 3)
    params = init_params(kp)
    prepared = prepare_params(params)   # one-time prep, off the call path

    # Dropout layers are identity in inference mode (no RNG applied).
    # TODO(synk): training-mode dropout (stochastic masking) is not implemented.

    # Small batch: single grid step, single (full) tile.
    B = 16
    x = jax.random.normal(kx, (B, NUM_FEATURES), jnp.float32)
    out = jax.block_until_ready(basic_classification_head(x, prepared))
    assert out.shape == (B, NUM_CLASSES)
    ref_bf16 = _reference(x, params, compute_dtype=jnp.bfloat16)
    ref_f32 = _reference(x, params, compute_dtype=jnp.float32)
    assert jnp.allclose(out, ref_bf16, atol=5e-3, rtol=5e-3)
    assert jnp.allclose(out, ref_f32, atol=5e-2, rtol=0)   # bf16 drift bound

    # Larger batch: exercises multi-step grid + ragged (masked) last block.
    B2 = 600
    x2 = jax.random.normal(kx2, (B2, NUM_FEATURES), jnp.float32)
    out2 = jax.block_until_ready(
        basic_classification_head(x2, prepared, batch_tile=256))
    assert out2.shape == (B2, NUM_CLASSES)
    ref2_bf16 = _reference(x2, params, compute_dtype=jnp.bfloat16)
    ref2_f32 = _reference(x2, params, compute_dtype=jnp.float32)
    assert jnp.allclose(out2, ref2_bf16, atol=5e-3, rtol=5e-3)
    assert jnp.allclose(out2, ref2_f32, atol=5e-2, rtol=0)

    print("KERNEL_OK")
</pallas_src>

<mosaic_0001>
module attributes {stable_mosaic.version = 11 : i64} {
  func.func @_mlp_head_kernel(%arg0: i32, %arg1: memref<16x256xf32, #tpu.memory_space<vmem>>, %arg2: memref<256x128xbf16, #tpu.memory_space<vmem>>, %arg3: memref<1x128xf32, #tpu.memory_space<vmem>>, %arg4: memref<128x128xbf16, #tpu.memory_space<vmem>>, %arg5: memref<1x128xf32, #tpu.memory_space<vmem>>, %arg6: memref<128x8xbf16, #tpu.memory_space<vmem>>, %arg7: memref<1x8xf32, #tpu.memory_space<vmem>>, %arg8: memref<16x8xf32, #tpu.memory_space<vmem>>) attributes {dimension_semantics = [#tpu.dimension_semantics<parallel>], iteration_bounds = array<i64: 1>, scalar_prefetch = 0 : i64, scratch_operands = 0 : i64, tpu.core_type = #tpu.core_type<tc>, window_params = [{transform_indices = @transform_0, window_bounds = array<i64: 16, 256>}, {pipeline_mode = #tpu.pipeline_mode<synchronous>, transform_indices = @transform_1, window_bounds = array<i64: 256, 128>}, {pipeline_mode = #tpu.pipeline_mode<synchronous>, transform_indices = @transform_2, window_bounds = array<i64: 1, 128>}, {pipeline_mode = #tpu.pipeline_mode<synchronous>, transform_indices = @transform_3, window_bounds = array<i64: 128, 128>}, {pipeline_mode = #tpu.pipeline_mode<synchronous>, transform_indices = @transform_4, window_bounds = array<i64: 1, 128>}, {pipeline_mode = #tpu.pipeline_mode<synchronous>, transform_indices = @transform_5, window_bounds = array<i64: 128, 8>}, {pipeline_mode = #tpu.pipeline_mode<synchronous>, transform_indices = @transform_6, window_bounds = array<i64: 1, 8>}, {transform_indices = @transform_7, window_bounds = array<i64: 16, 8>}]} {
    %c0 = arith.constant 0 : index
    %c0_0 = arith.constant 0 : index
    %0 = vector.load %arg1[%c0, %c0_0] : memref<16x256xf32, #tpu.memory_space<vmem>>, vector<16x256xf32>
    %1 = arith.truncf %0 : vector<16x256xf32> to vector<16x256xbf16>
    %c0_1 = arith.constant 0 : index
    %c0_2 = arith.constant 0 : index
    %2 = vector.load %arg2[%c0_1, %c0_2] : memref<256x128xbf16, #tpu.memory_space<vmem>>, vector<256x128xbf16>
    %cst = arith.constant dense<0.000000e+00> : vector<16x128xf32>
    %3 = tpu.matmul %1, %2, %cst {dimension_numbers = #tpu.dot_dimension_numbers<[1], [0], [0], [1], [0, 0, 1, 1], [], []>} : vector<16x256xbf16>, vector<256x128xbf16>, vector<16x128xf32> -> vector<16x128xf32>
    %c0_3 = arith.constant 0 : index
    %c0_4 = arith.constant 0 : index
    %4 = vector.load %arg3[%c0_3, %c0_4] : memref<1x128xf32, #tpu.memory_space<vmem>>, vector<1x128xf32>
    %5 = vector.broadcast %4 : vector<1x128xf32> to vector<16x128xf32>
    %6 = arith.addf %3, %5 : vector<16x128xf32>
    %cst_5 = arith.constant 0.000000e+00 : f32
    %7 = vector.broadcast %cst_5 : f32 to vector<16x128xf32>
    %8 = arith.maximumf %6, %7 : vector<16x128xf32>
    %9 = arith.truncf %8 : vector<16x128xf32> to vector<16x128xbf16>
    %c0_6 = arith.constant 0 : index
    %c0_7 = arith.constant 0 : index
    %10 = vector.load %arg4[%c0_6, %c0_7] : memref<128x128xbf16, #tpu.memory_space<vmem>>, vector<128x128xbf16>
    %cst_8 = arith.constant dense<0.000000e+00> : vector<16x128xf32>
    %11 = tpu.matmul %9, %10, %cst_8 {dimension_numbers = #tpu.dot_dimension_numbers<[1], [0], [0], [1], [0, 0, 1, 1], [], []>} : vector<16x128xbf16>, vector<128x128xbf16>, vector<16x128xf32> -> vector<16x128xf32>
    %c0_9 = arith.constant 0 : index
    %c0_10 = arith.constant 0 : index
    %12 = vector.load %arg5[%c0_9, %c0_10] : memref<1x128xf32, #tpu.memory_space<vmem>>, vector<1x128xf32>
    %13 = vector.broadcast %12 : vector<1x128xf32> to vector<16x128xf32>
    %14 = arith.addf %11, %13 : vector<16x128xf32>
    %cst_11 = arith.constant 0.000000e+00 : f32
    %15 = vector.broadcast %cst_11 : f32 to vector<16x128xf32>
    %16 = arith.maximumf %14, %15 : vector<16x128xf32>
    %17 = arith.truncf %16 : vector<16x128xf32> to vector<16x128xbf16>
    %c0_12 = arith.constant 0 : index
    %c0_13 = arith.constant 0 : index
    %18 = vector.load %arg6[%c0_12, %c0_13] : memref<128x8xbf16, #tpu.memory_space<vmem>>, vector<128x8xbf16>
    %cst_14 = arith.constant dense<0.000000e+00> : vector<16x8xf32>
    %19 = tpu.matmul %17, %18, %cst_14 {dimension_numbers = #tpu.dot_dimension_numbers<[1], [0], [0], [1], [0, 0, 1, 1], [], []>} : vector<16x128xbf16>, vector<128x8xbf16>, vector<16x8xf32> -> vector<16x8xf32>
    %c0_15 = arith.constant 0 : index
    %c0_16 = arith.constant 0 : index
    %20 = vector.load %arg7[%c0_15, %c0_16] : memref<1x8xf32, #tpu.memory_space<vmem>>, vector<1x8xf32>
    %21 = vector.broadcast %20 : vector<1x8xf32> to vector<16x8xf32>
    %22 = arith.addf %19, %21 : vector<16x8xf32>
    %c0_17 = arith.constant 0 : index
    %c0_18 = arith.constant 0 : index
    %23 = vector.load %arg8[%c0_17, %c0_18] : memref<16x8xf32, #tpu.memory_space<vmem>>, vector<16x8xf32>
    tpu.vector_store %arg8[%c0_17, %c0_18], %22 {strides = array<i32>} : memref<16x8xf32, #tpu.memory_space<vmem>>, vector<16x8xf32>,
    return
  }
  func.func @transform_0(%arg0: i32) -> (i32, i32) {
    %c0_i32 = arith.constant 0 : i32
    %c0_i32_0 = arith.constant 0 : i32
    return %arg0, %c0_i32 : i32, i32
  }
  func.func @transform_1(%arg0: i32) -> (i32, i32) {
    %c0_i32 = arith.constant 0 : i32
    %c0_i32_0 = arith.constant 0 : i32
    %c0_i32_1 = arith.constant 0 : i32
    return %c0_i32, %c0_i32_0 : i32, i32
  }
  func.func @transform_2(%arg0: i32) -> (i32, i32) {
    %c0_i32 = arith.constant 0 : i32
    %c0_i32_0 = arith.constant 0 : i32
    %c0_i32_1 = arith.constant 0 : i32
    return %c0_i32, %c0_i32_0 : i32, i32
  }
  func.func @transform_3(%arg0: i32) -> (i32, i32) {
    %c0_i32 = arith.constant 0 : i32
    %c0_i32_0 = arith.constant 0 : i32
    %c0_i32_1 = arith.constant 0 : i32
    return %c0_i32, %c0_i32_0 : i32, i32
  }
  func.func @transform_4(%arg0: i32) -> (i32, i32) {
    %c0_i32 = arith.constant 0 : i32
    %c0_i32_0 = arith.constant 0 : i32
    %c0_i32_1 = arith.constant 0 : i32
    return %c0_i32, %c0_i32_0 : i32, i32
  }
  func.func @transform_5(%arg0: i32) -> (i32, i32) {
    %c0_i32 = arith.constant 0 : i32
    %c0_i32_0 = arith.constant 0 : i32
    %c0_i32_1 = arith.constant 0 : i32
    return %c0_i32, %c0_i32_0 : i32, i32
  }
  func.func @transform_6(%arg0: i32) -> (i32, i32) {
    %c0_i32 = arith.constant 0 : i32
    %c0_i32_0 = arith.constant 0 : i32
    %c0_i32_1 = arith.constant 0 : i32
    return %c0_i32, %c0_i32_0 : i32, i32
  }
  func.func @transform_7(%arg0: i32) -> (i32, i32) {
    %c0_i32 = arith.constant 0 : i32
    %c0_i32_0 = arith.constant 0 : i32
    return %arg0, %c0_i32 : i32, i32
  }
}

</mosaic_0001>

<bundles_post_ra>
// kernel: tpu_custom_call.1
= control target key start
LH: loop header
LB: loop body
LE: loop exit
PB: predicated region body
PF: predicated region fallthrough
CT: control target
= control target key end

     0   :  { %12 = vsyncpa [#allocation3], 0  ;;  %s832_s0 = inlined_call_operand.hbm [shape: f32[16,256], index: 0, kind: input, shape index: {}]   ;;  %s833_s1 = inlined_call_operand.hbm [shape: bf16[256,128], index: 1, kind: input, shape index: {}]   ;;  %s834_s2 = inlined_call_operand.vmem [shape: f32[1,128], index: 2, kind: input, shape index: {}]   ;;  %s835_s3 = inlined_call_operand.vmem [shape: bf16[128,128], index: 3, kind: input, shape index: {}]   ;;  %s836_s4 = inlined_call_operand.vmem [shape: f32[1,128], index: 4, kind: input, shape index: {}]   ;;  %s837_s5 = inlined_call_operand.vmem [shape: bf16[128,8], index: 5, kind: input, shape index: {}]   ;;  %s838_s6 = inlined_call_operand.vmem [shape: f32[1,8], index: 6, kind: input, shape index: {}]   ;;  %s839_s7 = inlined_call_operand.vmem [shape: f32[16,8], index: 7, kind: output, shape index: {}]  }
   0x1   :  { %13 = vsyncpa [#allocation5], 0  ;;  %s679_s24 = smov [#allocation2]   ;;  %s631_s28 = scalar_lea.hbm %s832_s0, 512 }
   0x2   :  { %s19_s25 = sshll.u32 %s679_s24, 4  ;;  %p632_p0 = scmp.ne.s32.totalorder %s832_s0, %s631_s28  ;;  %s20_s25 = int_to_ptr.vmem [resolvable:$true] %s19_s25 }
   0x3   :  { %p635_p1 = scmp.lt.u32.totalorder %s631_s28, %s832_s0 }
   0x5   :  { %p637_p2 = pnand %p635_p1, %p632_p0 }
   0x7   :  { %640 = shalt.err (!%p637_p2)
}
   0x8   :  { %s641_s10 = scalar_lea.vmem %s20_s25, 512  ;;  %p646_p4 = scmp.lt.s32.totalorder %s20_s25, %s20_s25 }
   0x9   :  { %p642_p3 = scmp.ne.s32.totalorder %s20_s25, %s641_s10  ;;  %p647_p5 = scmp.lt.s32.totalorder %s641_s10, %s641_s10 }
   0xb   :  { %p648_p6 = por %p647_p5, %p646_p4 }
   0xd   :  { %p649_p7 = pnand %p648_p6, %p642_p3 }
   0xf   :  { %652 = shalt.err (!%p649_p7)
}
  0x10   :  { %s680_s11 = smov 256   ;;  %s681_s12 = smov 16  }
  0x11   :  { %25 = dma.hbm_to_vmem [thread:$0]  %s832_s0, 512, %s20_s25, [#allocation3], %s680_s11, %s680_s11, %s681_s12  }
  0x12   :  { %s682_s15 = smov [#allocation4]   ;;  %s653_s19 = scalar_lea.hbm %s833_s1, 2048 }
  0x13   :  { %s31_s16 = sshll.u32 %s682_s15, 4  ;;  %p654_p8 = scmp.ne.s32.totalorder %s833_s1, %s653_s19  ;;  %s32_s16 = int_to_ptr.vmem [resolvable:$true] %s31_s16 }
  0x14   :  { %p657_p9 = scmp.lt.u32.totalorder %s653_s19, %s833_s1 }
  0x16   :  { %p659_p10 = pnand %p657_p9, %p654_p8 }
  0x18   :  { %662 = shalt.err (!%p659_p10)
}
  0x19   :  { %s663_s24 = scalar_lea.vmem %s32_s16, 2048  ;;  %p668_p12 = scmp.lt.s32.totalorder %s32_s16, %s32_s16 }
  0x1a   :  { %p664_p11 = scmp.ne.s32.totalorder %s32_s16, %s663_s24  ;;  %p669_p13 = scmp.lt.s32.totalorder %s663_s24, %s663_s24 }
  0x1c   :  { %p670_p0 = por %p669_p13, %p668_p12 }
  0x1e   :  { %p671_p1 = pnand %p670_p0, %p664_p11 }
  0x20   :  { %674 = shalt.err (!%p671_p1)
}
  0x21   :  { %s683_s0 = smov 64   ;;  %s684_s25 = smov 4  }
  0x22   :  { %37 = dma.hbm_to_vmem [thread:$0]  %s833_s1, 2048, %s32_s16, [#allocation5], %s683_s0, %s683_s0, %s684_s25  }
  0x23   :  { %675 = dma.done.wait [#allocation3], 512  }
  0x24   :  { %676 = vsyncadd [#allocation3], 4294966784 }
  0x25   :  { %677 = dma.done.wait [#allocation5], 2048  }
  0x26   :  { %678 = vsyncadd [#allocation5], 4294965248  ;;  %v685_v0 = vmov 0.0   ;;  %v599_v1 = vld [vmem:[#allocation4 + $0x40] sm:$0xff]   ;;  %v601_v3 = vld [vmem:[#allocation4 + $0x48] sm:$0xff]   ;;  %vm686_vm0 = vmmov 0  }
  0x27   :  { %551 = vmatprep.subr.bf16.mxu1 %v685_v0  ;;  %v600_v2 = vld [vmem:[#allocation4] sm:$0xff]   ;;  %511 = vmatprep.subr.bf16.mxu0 %v599_v1  ;;  %v602_v4 = vld [vmem:[#allocation4 + $0x8] sm:$0xff]   ;;  %v603_v5 = vld [vmem:[#allocation4 + $0x50] sm:$0xff]   ;;  %vm467_vm1 = vcmask 64512  }
  0x28   :  { %512 = vmatpush3.bf16.msra.mxu0 %v600_v2  ;;  %v604_v6 = vld [vmem:[#allocation4 + $0x10] sm:$0xff]   ;;  %v605_v7 = vld [vmem:[#allocation4 + $0x58] sm:$0xff]   ;;  %v607_v9 = vld [vmem:[#allocation4 + $0x60] sm:$0xff]   ;;  %567 = vmatprep.mubr.msk.bf16.mxu1 %vm686_vm0, %v685_v0 }
  0x29   :  { %513 = vmatprep.subr.bf16.mxu0 %v601_v3  ;;  %v606_v8 = vld [vmem:[#allocation4 + $0x18] sm:$0xff]   ;;  %v608_v10 = vld [vmem:[#allocation4 + $0x20] sm:$0xff]   ;;  %v609_v11 = vld [vmem:[#allocation4 + $0x68] sm:$0xff]  }
  0x2a   :  { %v56_v12 = vld [vmem:[#allocation2 + $0x8] sm:$0xff]  ;;  %v58_v13 = vld [vmem:[#allocation2 + $0x18] sm:$0xff]  ;;  %v615_v16 = vld [vmem:[%s835_s3] sm:$0xff]  }
  0x2b   :  { %v610_v14 = vld [vmem:[#allocation4 + $0x28] sm:$0xff]   ;;  %v60_v15 = vpack.c.bf16 %v58_v13, %v56_v12  ;;  %v611_v17 = vld [vmem:[#allocation4 + $0x70] sm:$0xff]   ;;  %552 = vmatpush3.bf16.msra.mxu1 %v615_v16  ;;  %v613_v20 = vld [vmem:[#allocation4 + $0x78] sm:$0xff]  }
  0x2c   :  { %514 = vmatpush3.bf16.msra.mxu0 %v602_v4  ;;  %v616_v18 = vld [vmem:[%s835_s3 + $0x8] sm:$0xff]   ;;  %v612_v19 = vld [vmem:[#allocation4 + $0x30] sm:$0xff]   ;;  %553 = vmatprep.subr.bf16.mxu1 %v685_v0  ;;  %v614_v22 = vld [vmem:[#allocation4 + $0x38] sm:$0xff]  }
  0x2d   :  { %515 = vmatprep.subr.bf16.mxu0 %v603_v5  ;;  %228 = vmatprep.mubr.bf16.mxu0 %v60_v15  ;;  %v617_v21 = vld [vmem:[%s835_s3 + $0x10] sm:$0xff]   ;;  %v55_v23 = vld [vmem:[#allocation2] sm:$0xff]  ;;  %v618_v25 = vld [vmem:[%s835_s3 + $0x18] sm:$0xff]  }
  0x2e   :  { %v57_v24 = vld [vmem:[#allocation2 + $0x10] sm:$0xff]  ;;  %v619_v27 = vld [vmem:[%s835_s3 + $0x20] sm:$0xff]   ;;  %v620_v28 = vld [vmem:[%s835_s3 + $0x28] sm:$0xff]  }
  0x2f   :  { %554 = vmatpush3.bf16.msra.mxu1 %v616_v18  ;;  %v59_v26 = vpack.c.bf16 %v57_v24, %v55_v23  ;;  %v621_v29 = vld [vmem:[%s835_s3 + $0x30] sm:$0xff]   ;;  %v622_v30 = vld [vmem:[%s835_s3 + $0x38] sm:$0xff]   ;;  %v623_v31 = vld [vmem:[%s837_s5] sm:$0xff]  }
  0x30   :  { %516 = vmatpush3.bf16.msra.mxu0 %v604_v6  ;;  %555 = vmatprep.subr.bf16.mxu1 %v685_v0  ;;  %v624_v32 = vld [vmem:[%s837_s5 + $0x8] sm:$0xff]   ;;  %v625_v33 = vld [vmem:[%s837_s5 + $0x10] sm:$0xff]   ;;  %v626_v34 = vld [vmem:[%s837_s5 + $0x18] sm:$0xff]  }
  0x31   :  { %517 = vmatprep.subr.bf16.mxu0 %v605_v7  ;;  %v627_v35 = vld [vmem:[%s837_s5 + $0x20] sm:$0xff]   ;;  %v628_v36 = vld [vmem:[%s837_s5 + $0x28] sm:$0xff]   ;;  %v629_v49 = vld [vmem:[%s837_s5 + $0x30] sm:$0xff]  }
  0x32   :  { %v476_v38 = vld [vmem:[%s834_s2] ss:$0 sm:$0xff]  ;;  %v630_v50 = vld [vmem:[%s837_s5 + $0x38] sm:$0xff]  }
  0x33   :  { %556 = vmatpush3.bf16.msra.mxu1 %v617_v21  ;;  %v493_v51 = vld [vmem:[%s836_s4] ss:$0 sm:$0xff] }
  0x34   :  { %518 = vmatpush3.bf16.msra.mxu0 %v606_v8  ;;  %557 = vmatprep.subr.bf16.mxu1 %v685_v0  ;;  %v502_v61 = vld [vmem:[%s838_s6] ss:$0 sm:$0xff] }
  0x35   :  { %519 = vmatprep.subr.bf16.mxu0 %v607_v9 }
  0x37   :  { %558 = vmatpush3.bf16.msra.mxu1 %v618_v25 }
  0x38   :  { %520 = vmatpush3.bf16.msra.mxu0 %v608_v10  ;;  %559 = vmatprep.subr.bf16.mxu1 %v685_v0 }
  0x39   :  { %521 = vmatprep.subr.bf16.mxu0 %v609_v11 }
  0x3b   :  { %560 = vmatpush3.bf16.msra.mxu1 %v619_v27 }
  0x3c   :  { %522 = vmatpush3.bf16.msra.mxu0 %v610_v14  ;;  %561 = vmatprep.subr.bf16.mxu1 %v685_v0 }
  0x3d   :  { %523 = vmatprep.subr.bf16.mxu0 %v611_v17 }
  0x3f   :  { %562 = vmatpush3.bf16.msra.mxu1 %v620_v28 }
  0x40   :  { %524 = vmatpush3.bf16.msra.mxu0 %v612_v19  ;;  %563 = vmatprep.subr.bf16.mxu1 %v685_v0 }
  0x41   :  { %525 = vmatprep.subr.bf16.mxu0 %v613_v20 }
  0x43   :  { %564 = vmatpush3.bf16.msra.mxu1 %v621_v29 }
  0x44   :  { %526 = vmatpush3.bf16.msra.mxu0 %v614_v22  ;;  %565 = vmatprep.subr.bf16.mxu1 %v685_v0 }
  0x45   :  { %571 = vmatprep.subr.bf16.mxu0 %v685_v0 }
  0x47   :  { %229 = vmatmul.mubr.bf16.vlgmr.msra.gmra.mrb[0].mxu0 %v59_v26  ;;  %566 = vmatpush3.bf16.msra.mxu1 %v622_v30 }
  0x48   :  { %587 = vmatprep.mubr.msk.bf16.mxu0 %vm686_vm0, %v685_v0  ;;  %572 = vmatpush3.bf16.msra.mxu0 %v623_v31 }
  0x49   :  { %573 = vmatprep.subr.bf16.mxu0 %v685_v0 }
  0x4c   :  { %574 = vmatpush3.bf16.msra.mxu0 %v624_v32 }
  0x4d   :  { %575 = vmatprep.subr.bf16.mxu0 %v685_v0 }
  0x50   :  { %576 = vmatpush3.bf16.msra.mxu0 %v625_v33 }
  0x51   :  { %577 = vmatprep.subr.bf16.mxu0 %v685_v0 }
  0x54   :  { %578 = vmatpush3.bf16.msra.mxu0 %v626_v34 }
  0x55   :  { %579 = vmatprep.subr.bf16.mxu0 %v685_v0 }
  0x58   :  { %580 = vmatpush3.bf16.msra.mxu0 %v627_v35 }
  0x59   :  { %581 = vmatprep.subr.bf16.mxu0 %v685_v0 }
  0x5c   :  { %582 = vmatpush3.bf16.msra.mxu0 %v628_v36 }
  0x5d   :  { %583 = vmatprep.subr.bf16.mxu0 %v685_v0 }
  0x60   :  { %584 = vmatpush3.bf16.msra.mxu0 %v629_v49 }
  0x61   :  { %585 = vmatprep.subr.bf16.mxu0 %v685_v0 }
  0x64   :  { %586 = vmatpush3.bf16.msra.mxu0 %v630_v50 }
 0x11a   :  { %v527_v37 = vpop.f32.mrb[0].mxu0 }
 0x11b   :  { %v528_v39 = vpop.f32.mrb[1].mxu0 }
 0x11c   :  { %v529_v40 = vadd.f32 %v528_v39, %v527_v37  ;;  %v530_v41 = vpop.f32.mrb[2].mxu0 }
 0x11d   :  { %v531_v42 = vpop.f32.mrb[3].mxu0 }
 0x11e   :  { %v231_v43 = vadd.f32 %v529_v40, %v476_v38  ;;  %v532_v44 = vadd.f32 %v531_v42, %v530_v41 }
 0x120   :  { %v234_v45 = vadd.f32 %v532_v44, %v476_v38  ;;  %v237_v46 = vmax.f32 %v231_v43, 0.0 }
 0x122   :  { %v238_v47 = vmax.f32 %v234_v45, 0.0 }
 0x124   :  { %v239_v48 = vpack.c.bf16 %v238_v47, %v237_v46 }
 0x126   :  { %568 = vmatmul.mubr.bf16.vlgmr.msra.gmra.mrb[0].mxu1 %v239_v48 }
 0x1f9   :  { %v345_v52 = vpop.f32.mrb[0].mxu1 }
 0x1fa   :  { %v346_v53 = vadd.f32 %v493_v51, %v345_v52  ;;  %v569_v54 = vpop.f32.mrb[1].mxu1 }
 0x1fb   :  { %v348_v55 = vpop.f32.mrb[2].mxu1 }
 0x1fc   :  { %v349_v56 = vadd.f32 %v493_v51, %v348_v55  ;;  %v570_v57 = vpop.f32.mrb[3].mxu1  ;;  %v352_v58 = vmax.f32 %v346_v53, 0.0 }
 0x1fe   :  { %v353_v59 = vmax.f32 %v349_v56, 0.0 }
 0x200   :  { %v354_v60 = vpack.c.bf16 %v353_v59, %v352_v58 }
 0x202   :  { %588 = vmatmul.mubr.bf16.vlgmr.msra.gmra.mrb[4].mxu0 %v354_v60 }
 0x2d5   :  { %v460_v62 = vpop.f32.mrb[4].mxu0 }
 0x2d6   :  { %v461_v63 = vadd.f32 %v502_v61, %v460_v62  ;;  %v589_v0 = vpop.f32.mrb[5].mxu0 }
 0x2d7   :  { %v463_v1 = vpop.f32.mrb[6].mxu0 }
 0x2d8   :  { %468 = vst.msk [vmem:[%s839_s7] sm:$0xff] %vm467_vm1, %v461_v63  ;;  %v464_v2 = vadd.f32 %v502_v61, %v463_v1  ;;  %v590_v3 = vpop.f32.mrb[7].mxu0 }
 0x2da   :  { %469 = vst.msk [vmem:[%s839_s7 + $0x8] sm:$0xff] %vm467_vm1, %v464_v2 }
 0x2db   :  { %474 = vsyncpa [#allocation3], 1 }
 0x2dc   :  { %475 = vsyncpa [#allocation5], 1 }

</bundles_post_ra>
